<compile_context>
chip_gen: v7x
topology: tpu7x:2x2x1
jax: 0.10.0
libtpu: 0.0.40
codegen_flags: <defaults>
</compile_context>

<pallas_src>
import functools
import math

import jax
import jax.numpy as jnp
import numpy as np
from jax import lax
from jax.experimental import pallas as pl
from jax.experimental.pallas import tpu as pltpu


def fused_attention_kernel(x_ref, wqkv_ref, o_ref, *, n_head, hsz):
    """One batch element: fused QKV projection + causal attention, all heads.

    x_ref:    (1, T, C)  float32
    wqkv_ref: (C, 3*C)   bfloat16, laid out as [Wq_all | Wk_all | Wv_all]
    o_ref:    (1, T, C)  float32  (heads concatenated along the feature axis)
    """
    x = x_ref[0].astype(jnp.bfloat16)          # (T, C)
    wqkv = wqkv_ref[...]                       # (C, 3C) bf16

    # Fused QKV projection: single MXU matmul, N = 3*C (lane-dense).
    qkv = jnp.dot(x, wqkv, preferred_element_type=jnp.float32)   # (T, 3C) f32
    qkv = qkv.astype(jnp.bfloat16)

    T = x.shape[0]
    C = n_head * hsz
    scale = hsz ** -0.5

    # Causal mask, hoisted out of the per-head loop.
    row = lax.broadcasted_iota(jnp.int32, (T, T), 0)
    col = lax.broadcasted_iota(jnp.int32, (T, T), 1)
    causal = col <= row

    head_outs = []
    for h in range(n_head):                    # static unroll over heads
        q = qkv[:, h * hsz:(h + 1) * hsz]                  # (T, hsz) bf16
        k = qkv[:, C + h * hsz:C + (h + 1) * hsz]          # (T, hsz) bf16
        v = qkv[:, 2 * C + h * hsz:2 * C + (h + 1) * hsz]  # (T, hsz) bf16

        # q @ k^T via contraction dims (no materialized transpose of k).
        att = lax.dot_general(
            q, k, (((1,), (1,)), ((), ())),
            preferred_element_type=jnp.float32) * scale    # (T, T) f32
        att = jnp.where(causal, att, -jnp.inf)

        # Softmax in f32; divide replaced by EUP approx reciprocal.
        m = jnp.max(att, axis=-1, keepdims=True)
        p = jnp.exp(att - m)
        s = jnp.sum(p, axis=-1, keepdims=True)
        p = p * pl.reciprocal(s, approx=True)

        # dropout(p=0.0) is the identity.
        head_outs.append(
            jnp.dot(p.astype(jnp.bfloat16), v,
                    preferred_element_type=jnp.float32))   # (T, hsz) f32

    # One lane-dense (T, C) store (heads concatenated on the feature axis).
    o_ref[0] = jnp.concatenate(head_outs, axis=-1).astype(o_ref.dtype)


def proj_kernel(y_ref, w_ref, b_ref, o_ref):
    """Row-tiled output projection: (rows, C) @ (C, C) + bias."""
    y = y_ref[...].astype(jnp.bfloat16)
    o_ref[...] = (
        jnp.dot(y, w_ref[...], preferred_element_type=jnp.float32)
        + b_ref[...]
    )


def multi_head_attention(x, wqkv_bf16, wp_bf16, bp, *, n_head):
    """x: (B, T, C) f32; wqkv_bf16: (C, 3C) bf16; wp_bf16: (C, C) bf16;
    bp: (1, C) f32. Returns (B, T, C) f32."""
    B, T, C = x.shape
    hsz = C // n_head

    compiler_params = pltpu.CompilerParams(
        dimension_semantics=("parallel",),
        vmem_limit_bytes=48 * 1024 * 1024,
    )

    # --- Kernel 1: fused QKV + attention, output already (B, T, C) ---------
    attn_out = pl.pallas_call(
        functools.partial(fused_attention_kernel, n_head=n_head, hsz=hsz),
        out_shape=jax.ShapeDtypeStruct((B, T, C), jnp.float32),
        grid_spec=pltpu.PrefetchScalarGridSpec(
            num_scalar_prefetch=0,
            grid=(B,),
            in_specs=[
                pl.BlockSpec((1, T, C), lambda b: (b, 0, 0)),
                # Constant index map -> weight DMA'd once, resident across b.
                pl.BlockSpec((C, 3 * C), lambda b: (0, 0)),
            ],
            out_specs=pl.BlockSpec((1, T, C), lambda b: (b, 0, 0)),
        ),
        compiler_params=compiler_params,
    )(x, wqkv_bf16)

    # Heads are already concatenated in the feature axis; this reshape is a
    # free row-major view (no transpose, no extra HBM round-trip).
    rows = B * T
    y = attn_out.reshape(rows, C)

    # --- Kernel 2: row-tiled output projection ------------------------------
    row_tile = rows if rows <= 512 else 512
    out = pl.pallas_call(
        proj_kernel,
        out_shape=jax.ShapeDtypeStruct((rows, C), jnp.float32),
        grid_spec=pltpu.PrefetchScalarGridSpec(
            num_scalar_prefetch=0,
            grid=(pl.cdiv(rows, row_tile),),
            in_specs=[
                pl.BlockSpec((row_tile, C), lambda i: (i, 0)),
                pl.BlockSpec((C, C), lambda i: (0, 0)),      # resident weight
                pl.BlockSpec((1, C), lambda i: (0, 0)),      # bias
            ],
            out_specs=pl.BlockSpec((row_tile, C), lambda i: (i, 0)),
        ),
        compiler_params=compiler_params,
    )(y, wp_bf16, bp)

    # Final dropout(p=0.0) is the identity.
    return out.reshape(B, T, C)


def reference_mha(x, wq, wk, wv, wp, bp):
    """Pure-JAX f32 reference matching the PyTorch module semantics."""
    B, T, C = x.shape
    n_head, _, hsz = wq.shape
    heads = []
    for h in range(n_head):
        q = x @ wq[h]
        k = x @ wk[h]
        v = x @ wv[h]
        att = (q @ jnp.swapaxes(k, -2, -1)) * (hsz ** -0.5)
        mask = jnp.tril(jnp.ones((T, T)))
        att = jnp.where(mask == 0, -jnp.inf, att)
        att = jax.nn.softmax(att, axis=-1)
        heads.append(att @ v)
    y = jnp.concatenate(heads, axis=-1)
    return y @ wp + bp[0]


if __name__ == "__main__":
    # Small config consistent with the module (n_embd divisible by n_head).
    B, T = 2, 8
    n_embd, n_head = 32, 4
    hsz = n_embd // n_head

    key = jax.random.PRNGKey(0)
    kx, kq, kk, kv, kp, kb = jax.random.split(key, 6)

    std = 0.02
    x = jax.random.normal(kx, (B, T, n_embd), dtype=jnp.float32)
    # Weights pre-transposed to (in_features, out_features), one slab per head.
    wq = jax.random.normal(kq, (n_head, n_embd, hsz), dtype=jnp.float32) * std
    wk = jax.random.normal(kk, (n_head, n_embd, hsz), dtype=jnp.float32) * std
    wv = jax.random.normal(kv, (n_head, n_embd, hsz), dtype=jnp.float32) * std
    wp = jax.random.normal(kp, (n_embd, n_embd), dtype=jnp.float32) * std
    bp = jax.random.normal(kb, (1, n_embd), dtype=jnp.float32) * std

    # Pack per-head Q/K/V weights into one fused (C, 3C) bf16 matrix:
    # [ all-heads Q | all-heads K | all-heads V ], head-major inside each third.
    def pack(w):  # (n_head, C, hsz) -> (C, n_head*hsz)
        return jnp.transpose(w, (1, 0, 2)).reshape(n_embd, n_head * hsz)

    wqkv_bf16 = jnp.concatenate([pack(wq), pack(wk), pack(wv)],
                                axis=1).astype(jnp.bfloat16)
    wp_bf16 = wp.astype(jnp.bfloat16)

    out = multi_head_attention(x, wqkv_bf16, wp_bf16, bp, n_head=n_head)
    out = jax.block_until_ready(out)

    ref = reference_mha(x, wq, wk, wv, wp, bp)
    # Tolerance accounts for bf16 matmul inputs + approx reciprocal.
    np.testing.assert_allclose(np.asarray(out), np.asarray(ref),
                               rtol=5e-2, atol=5e-3)
    print("KERNEL_OK")
</pallas_src>

<mosaic_0001>
module attributes {stable_mosaic.version = 11 : i64} {
  func.func @fused_attention_kernel(%arg0: i32, %arg1: memref<1x8x32xf32, #tpu.memory_space<vmem>>, %arg2: memref<32x96xbf16, #tpu.memory_space<vmem>>, %arg3: memref<1x8x32xf32, #tpu.memory_space<vmem>>) attributes {dimension_semantics = [#tpu.dimension_semantics<parallel>], iteration_bounds = array<i64: 2>, scalar_prefetch = 0 : i64, scratch_operands = 0 : i64, tpu.core_type = #tpu.core_type<tc>, window_params = [{transform_indices = @transform_0, window_bounds = array<i64: 1, 8, 32>}, {pipeline_mode = #tpu.pipeline_mode<synchronous>, transform_indices = @transform_1, window_bounds = array<i64: 32, 96>}, {transform_indices = @transform_2, window_bounds = array<i64: 1, 8, 32>}]} {
    %c0 = arith.constant 0 : index
    %c0_0 = arith.constant 0 : index
    %c0_1 = arith.constant 0 : index
    %0 = vector.load %arg1[%c0, %c0_0, %c0_1] : memref<1x8x32xf32, #tpu.memory_space<vmem>>, vector<1x8x32xf32>
    %1 = vector.shape_cast %0 : vector<1x8x32xf32> to vector<8x32xf32>
    %2 = arith.truncf %1 : vector<8x32xf32> to vector<8x32xbf16>
    %c0_2 = arith.constant 0 : index
    %c0_3 = arith.constant 0 : index
    %3 = vector.load %arg2[%c0_2, %c0_3] : memref<32x96xbf16, #tpu.memory_space<vmem>>, vector<32x96xbf16>
    %cst = arith.constant dense<0.000000e+00> : vector<8x96xf32>
    %4 = tpu.matmul %2, %3, %cst {dimension_numbers = #tpu.dot_dimension_numbers<[1], [0], [0], [1], [0, 0, 1, 1], [], []>} : vector<8x32xbf16>, vector<32x96xbf16>, vector<8x96xf32> -> vector<8x96xf32>
    %5 = arith.truncf %4 : vector<8x96xf32> to vector<8x96xbf16>
    %6 = tpu.iota {dimensions = array<i32: 0>} : vector<8x8xi32>
    %7 = tpu.iota {dimensions = array<i32: 1>} : vector<8x8xi32>
    %8 = arith.cmpi sle, %7, %6 : vector<8x8xi32>
    %9 = vector.extract_strided_slice %5 {offsets = [0, 0], sizes = [8, 8], strides = [1, 1]} : vector<8x96xbf16> to vector<8x8xbf16>
    %10 = vector.extract_strided_slice %5 {offsets = [0, 32], sizes = [8, 8], strides = [1, 1]} : vector<8x96xbf16> to vector<8x8xbf16>
    %11 = vector.extract_strided_slice %5 {offsets = [0, 64], sizes = [8, 8], strides = [1, 1]} : vector<8x96xbf16> to vector<8x8xbf16>
    %cst_4 = arith.constant dense<0.000000e+00> : vector<8x8xf32>
    %12 = tpu.matmul %9, %10, %cst_4 {dimension_numbers = #tpu.dot_dimension_numbers<[1], [1], [0], [0], [0, 0, 1, 0], [], []>} : vector<8x8xbf16>, vector<8x8xbf16>, vector<8x8xf32> -> vector<8x8xf32>
    %cst_5 = arith.constant 0.353553385 : f32
    %13 = vector.broadcast %cst_5 : f32 to vector<8x8xf32>
    %14 = arith.mulf %12, %13 : vector<8x8xf32>
    %cst_6 = arith.constant 0xFF800000 : f32
    %15 = vector.broadcast %cst_6 : f32 to vector<8x8xf32>
    %16 = arith.select %8, %14, %15 : vector<8x8xi1>, vector<8x8xf32>
    %cst_7 = arith.constant dense<0xFF800000> : vector<8xf32>
    %17 = vector.multi_reduction <maximumf>, %16, %cst_7 [1] : vector<8x8xf32> to vector<8xf32>
    %18 = vector.shape_cast %17 : vector<8xf32> to vector<8x1xf32>
    %19 = vector.broadcast %18 : vector<8x1xf32> to vector<8x8xf32>
    %20 = arith.subf %16, %19 : vector<8x8xf32>
    %21 = math.exp %20 : vector<8x8xf32>
    %cst_8 = arith.constant dense<0.000000e+00> : vector<8xf32>
    %22 = vector.multi_reduction <add>, %21, %cst_8 [1] : vector<8x8xf32> to vector<8xf32>
    %23 = vector.shape_cast %22 : vector<8xf32> to vector<8x1xf32>
    %24 = tpu.reciprocal %23 {approx = true} : vector<8x1xf32> -> vector<8x1xf32>
    %25 = vector.broadcast %24 : vector<8x1xf32> to vector<8x8xf32>
    %26 = arith.mulf %21, %25 : vector<8x8xf32>
    %27 = arith.truncf %26 : vector<8x8xf32> to vector<8x8xbf16>
    %cst_9 = arith.constant dense<0.000000e+00> : vector<8x8xf32>
    %28 = tpu.matmul %27, %11, %cst_9 {dimension_numbers = #tpu.dot_dimension_numbers<[1], [0], [0], [1], [0, 0, 1, 1], [], []>} : vector<8x8xbf16>, vector<8x8xbf16>, vector<8x8xf32> -> vector<8x8xf32>
    %29 = vector.extract_strided_slice %5 {offsets = [0, 8], sizes = [8, 8], strides = [1, 1]} : vector<8x96xbf16> to vector<8x8xbf16>
    %30 = vector.extract_strided_slice %5 {offsets = [0, 40], sizes = [8, 8], strides = [1, 1]} : vector<8x96xbf16> to vector<8x8xbf16>
    %31 = vector.extract_strided_slice %5 {offsets = [0, 72], sizes = [8, 8], strides = [1, 1]} : vector<8x96xbf16> to vector<8x8xbf16>
    %cst_10 = arith.constant dense<0.000000e+00> : vector<8x8xf32>
    %32 = tpu.matmul %29, %30, %cst_10 {dimension_numbers = #tpu.dot_dimension_numbers<[1], [1], [0], [0], [0, 0, 1, 0], [], []>} : vector<8x8xbf16>, vector<8x8xbf16>, vector<8x8xf32> -> vector<8x8xf32>
    %cst_11 = arith.constant 0.353553385 : f32
    %33 = vector.broadcast %cst_11 : f32 to vector<8x8xf32>
    %34 = arith.mulf %32, %33 : vector<8x8xf32>
    %cst_12 = arith.constant 0xFF800000 : f32
    %35 = vector.broadcast %cst_12 : f32 to vector<8x8xf32>
    %36 = arith.select %8, %34, %35 : vector<8x8xi1>, vector<8x8xf32>
    %cst_13 = arith.constant dense<0xFF800000> : vector<8xf32>
    %37 = vector.multi_reduction <maximumf>, %36, %cst_13 [1] : vector<8x8xf32> to vector<8xf32>
    %38 = vector.shape_cast %37 : vector<8xf32> to vector<8x1xf32>
    %39 = vector.broadcast %38 : vector<8x1xf32> to vector<8x8xf32>
    %40 = arith.subf %36, %39 : vector<8x8xf32>
    %41 = math.exp %40 : vector<8x8xf32>
    %cst_14 = arith.constant dense<0.000000e+00> : vector<8xf32>
    %42 = vector.multi_reduction <add>, %41, %cst_14 [1] : vector<8x8xf32> to vector<8xf32>
    %43 = vector.shape_cast %42 : vector<8xf32> to vector<8x1xf32>
    %44 = tpu.reciprocal %43 {approx = true} : vector<8x1xf32> -> vector<8x1xf32>
    %45 = vector.broadcast %44 : vector<8x1xf32> to vector<8x8xf32>
    %46 = arith.mulf %41, %45 : vector<8x8xf32>
    %47 = arith.truncf %46 : vector<8x8xf32> to vector<8x8xbf16>
    %cst_15 = arith.constant dense<0.000000e+00> : vector<8x8xf32>
    %48 = tpu.matmul %47, %31, %cst_15 {dimension_numbers = #tpu.dot_dimension_numbers<[1], [0], [0], [1], [0, 0, 1, 1], [], []>} : vector<8x8xbf16>, vector<8x8xbf16>, vector<8x8xf32> -> vector<8x8xf32>
    %49 = vector.extract_strided_slice %5 {offsets = [0, 16], sizes = [8, 8], strides = [1, 1]} : vector<8x96xbf16> to vector<8x8xbf16>
    %50 = vector.extract_strided_slice %5 {offsets = [0, 48], sizes = [8, 8], strides = [1, 1]} : vector<8x96xbf16> to vector<8x8xbf16>
    %51 = vector.extract_strided_slice %5 {offsets = [0, 80], sizes = [8, 8], strides = [1, 1]} : vector<8x96xbf16> to vector<8x8xbf16>
    %cst_16 = arith.constant dense<0.000000e+00> : vector<8x8xf32>
    %52 = tpu.matmul %49, %50, %cst_16 {dimension_numbers = #tpu.dot_dimension_numbers<[1], [1], [0], [0], [0, 0, 1, 0], [], []>} : vector<8x8xbf16>, vector<8x8xbf16>, vector<8x8xf32> -> vector<8x8xf32>
    %cst_17 = arith.constant 0.353553385 : f32
    %53 = vector.broadcast %cst_17 : f32 to vector<8x8xf32>
    %54 = arith.mulf %52, %53 : vector<8x8xf32>
    %cst_18 = arith.constant 0xFF800000 : f32
    %55 = vector.broadcast %cst_18 : f32 to vector<8x8xf32>
    %56 = arith.select %8, %54, %55 : vector<8x8xi1>, vector<8x8xf32>
    %cst_19 = arith.constant dense<0xFF800000> : vector<8xf32>
    %57 = vector.multi_reduction <maximumf>, %56, %cst_19 [1] : vector<8x8xf32> to vector<8xf32>
    %58 = vector.shape_cast %57 : vector<8xf32> to vector<8x1xf32>
    %59 = vector.broadcast %58 : vector<8x1xf32> to vector<8x8xf32>
    %60 = arith.subf %56, %59 : vector<8x8xf32>
    %61 = math.exp %60 : vector<8x8xf32>
    %cst_20 = arith.constant dense<0.000000e+00> : vector<8xf32>
    %62 = vector.multi_reduction <add>, %61, %cst_20 [1] : vector<8x8xf32> to vector<8xf32>
    %63 = vector.shape_cast %62 : vector<8xf32> to vector<8x1xf32>
    %64 = tpu.reciprocal %63 {approx = true} : vector<8x1xf32> -> vector<8x1xf32>
    %65 = vector.broadcast %64 : vector<8x1xf32> to vector<8x8xf32>
    %66 = arith.mulf %61, %65 : vector<8x8xf32>
    %67 = arith.truncf %66 : vector<8x8xf32> to vector<8x8xbf16>
    %cst_21 = arith.constant dense<0.000000e+00> : vector<8x8xf32>
    %68 = tpu.matmul %67, %51, %cst_21 {dimension_numbers = #tpu.dot_dimension_numbers<[1], [0], [0], [1], [0, 0, 1, 1], [], []>} : vector<8x8xbf16>, vector<8x8xbf16>, vector<8x8xf32> -> vector<8x8xf32>
    %69 = vector.extract_strided_slice %5 {offsets = [0, 24], sizes = [8, 8], strides = [1, 1]} : vector<8x96xbf16> to vector<8x8xbf16>
    %70 = vector.extract_strided_slice %5 {offsets = [0, 56], sizes = [8, 8], strides = [1, 1]} : vector<8x96xbf16> to vector<8x8xbf16>
    %71 = vector.extract_strided_slice %5 {offsets = [0, 88], sizes = [8, 8], strides = [1, 1]} : vector<8x96xbf16> to vector<8x8xbf16>
    %cst_22 = arith.constant dense<0.000000e+00> : vector<8x8xf32>
    %72 = tpu.matmul %69, %70, %cst_22 {dimension_numbers = #tpu.dot_dimension_numbers<[1], [1], [0], [0], [0, 0, 1, 0], [], []>} : vector<8x8xbf16>, vector<8x8xbf16>, vector<8x8xf32> -> vector<8x8xf32>
    %cst_23 = arith.constant 0.353553385 : f32
    %73 = vector.broadcast %cst_23 : f32 to vector<8x8xf32>
    %74 = arith.mulf %72, %73 : vector<8x8xf32>
    %cst_24 = arith.constant 0xFF800000 : f32
    %75 = vector.broadcast %cst_24 : f32 to vector<8x8xf32>
    %76 = arith.select %8, %74, %75 : vector<8x8xi1>, vector<8x8xf32>
    %cst_25 = arith.constant dense<0xFF800000> : vector<8xf32>
    %77 = vector.multi_reduction <maximumf>, %76, %cst_25 [1] : vector<8x8xf32> to vector<8xf32>
    %78 = vector.shape_cast %77 : vector<8xf32> to vector<8x1xf32>
    %79 = vector.broadcast %78 : vector<8x1xf32> to vector<8x8xf32>
    %80 = arith.subf %76, %79 : vector<8x8xf32>
    %81 = math.exp %80 : vector<8x8xf32>
    %cst_26 = arith.constant dense<0.000000e+00> : vector<8xf32>
    %82 = vector.multi_reduction <add>, %81, %cst_26 [1] : vector<8x8xf32> to vector<8xf32>
    %83 = vector.shape_cast %82 : vector<8xf32> to vector<8x1xf32>
    %84 = tpu.reciprocal %83 {approx = true} : vector<8x1xf32> -> vector<8x1xf32>
    %85 = vector.broadcast %84 : vector<8x1xf32> to vector<8x8xf32>
    %86 = arith.mulf %81, %85 : vector<8x8xf32>
    %87 = arith.truncf %86 : vector<8x8xf32> to vector<8x8xbf16>
    %cst_27 = arith.constant dense<0.000000e+00> : vector<8x8xf32>
    %88 = tpu.matmul %87, %71, %cst_27 {dimension_numbers = #tpu.dot_dimension_numbers<[1], [0], [0], [1], [0, 0, 1, 1], [], []>} : vector<8x8xbf16>, vector<8x8xbf16>, vector<8x8xf32> -> vector<8x8xf32>
    %89 = tpu.concatenate %28, %48, %68, %88 in 1 : vector<8x8xf32>, vector<8x8xf32>, vector<8x8xf32>, vector<8x8xf32> -> vector<8x32xf32>
    %c0_28 = arith.constant 0 : index
    %c0_29 = arith.constant 0 : index
    %c0_30 = arith.constant 0 : index
    %90 = vector.load %arg3[%c0_28, %c0_29, %c0_30] : memref<1x8x32xf32, #tpu.memory_space<vmem>>, vector<1x8x32xf32>
    %91 = vector.shape_cast %90 : vector<1x8x32xf32> to vector<8x32xf32>
    %92 = vector.shape_cast %89 : vector<8x32xf32> to vector<1x8x32xf32>
    tpu.vector_store %arg3[%c0_28, %c0_29, %c0_30], %92 {strides = array<i32>} : memref<1x8x32xf32, #tpu.memory_space<vmem>>, vector<1x8x32xf32>,
    return
  }
  func.func @transform_0(%arg0: i32) -> (i32, i32, i32) {
    %c0_i32 = arith.constant 0 : i32
    %c0_i32_0 = arith.constant 0 : i32
    %c0_i32_1 = arith.constant 0 : i32
    return %arg0, %c0_i32, %c0_i32_0 : i32, i32, i32
  }
  func.func @transform_1(%arg0: i32) -> (i32, i32) {
    %c0_i32 = arith.constant 0 : i32
    %c0_i32_0 = arith.constant 0 : i32
    %c0_i32_1 = arith.constant 0 : i32
    return %c0_i32, %c0_i32_0 : i32, i32
  }
  func.func @transform_2(%arg0: i32) -> (i32, i32, i32) {
    %c0_i32 = arith.constant 0 : i32
    %c0_i32_0 = arith.constant 0 : i32
    %c0_i32_1 = arith.constant 0 : i32
    return %arg0, %c0_i32, %c0_i32_0 : i32, i32, i32
  }
}

</mosaic_0001>

<bundles_post_ra>
// kernel: tpu_custom_call.1
= control target key start
LH: loop header
LB: loop body
LE: loop exit
PB: predicated region body
PF: predicated region fallthrough
CT: control target
= control target key end

     0   :  { %7 = vsyncpa [#allocation3], 0  ;;  %s1436_s0 = inlined_call_operand.hbm [shape: f32[2,8,32], index: 0, kind: input, shape index: {}]   ;;  %s1437_s1 = inlined_call_operand.hbm [shape: bf16[32,96], index: 1, kind: input, shape index: {}]   ;;  %s1438_s2 = inlined_call_operand.hbm [shape: f32[2,8,32], index: 2, kind: output, shape index: {}]  }
   0x1   :  { %9 = vsyncpa [#allocation3 + $0x1], 0 }
   0x2   :  { %10 = vsyncpa [#allocation6], 0 }
   0x3   :  { %11 = vsyncpa [#allocation4], 0 }
   0x4   :  { %13 = vsyncpa [#allocation4 + $0x1], 0  ;;  %s1163_s9 = smov 0   ;;  %s1165_s10 = smov 0  }
   0x5   :  { %s1167_s11 = smov 0   ;;  %s1169_s12 = smov 0  }
   0x6 LB: > { %s1184_s13 = sadd.s32 4294967295, %s1125_s12   ;;  %s804_s14 = sadd.s32 4294967294, %s1125_s12   ;;  %s1125_s12 = sphi %s1169_s12, %s1458_s12   ;;  %s1121_s11 = sphi %s1167_s11, %s1457_s11   ;;  %s1117_s10 = sphi %s1165_s10, %s1456_s10   ;;  %s1113_s9 = sphi %s1163_s9, %s1455_s9  }
   0x7   : > { %p39_p0 = scmp.ne.s32.totalorder %s1117_s10, %s1113_s9  ;;  %p1439_p1 = scmp.eq.s32.totalorder %s1184_s13, 0 }
   0x8   : > { %p90_p3 = scmp.eq.s32.totalorder %s804_s14, 1  ;;  %p805_p5 = scmp.ge.s32.totalorder %s1125_s12, 1 }
   0x9   : > { %p1193_p4 = por %p1439_p1, %p39_p0  ;;  %p97_p7 = scmp.lt.s32.totalorder %s1125_s12, 3 }
   0xa   : > { %p1198_p6 = por %p90_p3, %p39_p0  ;;  %s1127_s18 = smov [#allocation5]  }
   0xb   : > { %s1442_s15 = scalar_select %p1193_p4, 1, 0 }
   0xc   : > { %s1443_s16 = scalar_select %p1198_p6, 1, 0 }
   0xd   : > { %p1203_p8 = pnand %p805_p5, %p97_p7  ;;  %s109_s19 = sshll.u32 %s1127_s18, 4  ;;  %s1207_s19 = int_to_ptr.vmem [resolvable:$true] %s109_s19 }
   0xe   : > { %s1219_s21 = sadd.s32 1, %s1125_s12   ;;  %s26_s22 = sadd.s32 1, %s1121_s11 }
   0xf   : > { %s1444_s17 = scalar_select %p1203_p8, 1, 0 }
  0x10   : > { %p912_p9 = pneg %p1203_p8  ;;  %s23_s23 = ssub.s32 %s1125_s12, %s1219_s21 }
  0x11   : > { %s997_s26 = scalar_lea.hbm %s1437_s1, 256 }
  0x12   : > { %p1214_p11 = pnand %p912_p9, %p1439_p1  ;;  %p998_p12 = scmp.ne.s32.totalorder %s1437_s1, %s997_s26 }
  0x13   : > { %p1004_p5 = scmp.lt.u32.totalorder %s997_s26, %s1437_s1 }
  0x14   : > { %p999_p13 = pneg %p1214_p11 }
  0x16   : > { %p1000_p0 = pnand %p999_p13, %p998_p12 }
  0x18   : > { %p1001_p3 = pneg %p1000_p0 }
  0x1a   : > { %p1006_p7 = pnand %p1004_p5, %p1001_p3 }
  0x1c   : > { %1009 = shalt.err (!%p1006_p7)
}
  0x1d   : > { %s1010_s3 = scalar_lea.vmem %s1207_s19, 256  ;;  %p1018_p2 = scmp.lt.s32.totalorder %s1207_s19, %s1207_s19 }
  0x1e   : > { %p1011_p9 = scmp.ne.s32.totalorder %s1207_s19, %s1010_s3  ;;  %p1019_p6 = scmp.lt.s32.totalorder %s1010_s3, %s1010_s3 }
  0x20   : > { %p1013_p10 = pnand %p1011_p9, %p999_p13  ;;  %p1020_p4 = por %p1019_p6, %p1018_p2 }
  0x22   : > { %p1014_p1 = pneg %p1013_p10 }
  0x24   : > { %p1021_p8 = pnand %p1020_p4, %p1014_p1 }
  0x26   : > { %1024 = shalt.err (!%p1021_p8)
}
  0x27   : > { %s1128_s4 = smov 64   ;;  %s1129_s5 = smov 4  }
  0x28   : > { %915 = dma.hbm_to_vmem [thread:$0]  (!%p1214_p11), %s1437_s1, 256, %s1207_s19, [#allocation6], %s1128_s4, %s1128_s4, %s1129_s5  }
  0x29   : > { %p24_p2 = scmp.eq.s32.totalorder %s23_s23, 0  ;;  %p33_p1 = scmp.ne.s32.totalorder %s1121_s11, %s1117_s10 }
  0x2a   : > { %p34_p4 = scmp.eq.s32.totalorder %s1125_s12, 0  ;;  %p925_p6 = scmp.lt.s32.totalorder %s1125_s12, 2 }
  0x2b   : > { %s1250_s8 = scalar_select %p24_p2, %s1121_s11, %s26_s22  }
  0x2c   : > { %p35_p8 = por %p34_p4, %p33_p1  ;;  %p1446_p10 = scmp.eq.s32.totalorder %s1184_s13, 1 }
  0x2d   : > { %s123_s18 = sand.u32 1, %s1121_s11   ;;  %s809_s24 = sshll.u32 %s1125_s12, 7 }
  0x2e   : > { %p1254_p12 = por %p1446_p10, %p33_p1  ;;  %s808_s25 = sshll.u32 %s123_s18, 3 }
  0x2f   : > { %s1263_s27 = scalar_lea.hbm %s1436_s0, %s809_s24  ;;  %s127_s19 = scalar_lea.vmem [#allocation2], %s808_s25 }
  0x30   : > { %s134_s22 = sshll.u32 %s127_s19, 4  ;;  %p1265_p11 = pnand %p925_p6, %p35_p8  ;;  %s1269_s22 = int_to_ptr.vmem [resolvable:$true] %s134_s22 }
  0x31   : > { %s124_s28 = scalar_lea.sflag [#allocation3], %s123_s18  ;;  %s1025_s29 = scalar_lea.hbm %s1263_s27, 128 }
  0x32   : > { %p1026_p13 = scmp.ne.s32.totalorder %s1263_s27, %s1025_s29  ;;  %p1027_p0 = pneg %p1265_p11 }
  0x33   : > { %s1030_s4 = scalar_lea.hbm %s1436_s0, 256  ;;  %p1031_p7 = scmp.lt.u32.totalorder %s1263_s27, %s1436_s0 }
  0x34   : > { %p1028_p3 = pnand %p1027_p0, %p1026_p13  ;;  %p1032_p9 = scmp.lt.u32.totalorder %s1030_s4, %s1025_s29 }
  0x35   : > { %p1034_p1 = scmp.lt.u32.totalorder %s1025_s29, %s1263_s27 }
  0x36   : > { %p1029_p5 = pneg %p1028_p3  ;;  %p1033_p2 = por %p1032_p9, %p1031_p7 }
  0x38   : > { %p1035_p4 = por %p1034_p1, %p1033_p2 }
  0x3a   : > { %p1036_p6 = pnand %p1035_p4, %p1029_p5 }
  0x3c   : > { %1039 = shalt.err (!%p1036_p6)
}
  0x3d   : > { %s1040_s7 = scalar_lea.vmem %s1269_s22, 128  ;;  %s1130_s18 = smov [#allocation2]  }
  0x3e   : > { %p1041_p8 = scmp.ne.s32.totalorder %s1269_s22, %s1040_s7  ;;  %s1045_s24 = sshll.u32 %s1130_s18, 4  ;;  %s1046_s24 = int_to_ptr.vmem [resolvable:$false] %s1045_s24 }
  0x3f   : > { %s1047_s25 = scalar_lea.vmem %s1046_s24, 256  ;;  %p1048_p3 = scmp.lt.s32.totalorder %s1269_s22, %s1046_s24 }
  0x40   : > { %p1043_p10 = pnand %p1041_p8, %p1027_p0  ;;  %p1049_p7 = scmp.lt.s32.totalorder %s1047_s25, %s1040_s7 }
  0x42   : > { %p1044_p13 = pneg %p1043_p10  ;;  %p1050_p9 = por %p1049_p7, %p1048_p3 }
  0x44   : > { %p1051_p2 = pnand %p1050_p9, %p1044_p13 }
  0x46   : > { %1054 = shalt.err (!%p1051_p2)
}
  0x47   : > { %919 = dma.hbm_to_vmem [thread:$0]  (!%p1265_p11), %s1263_s27, 128, %s1269_s22, %s124_s28  }
  0x48   : > { %p1449_p5 = scmp.ne.s32.totalorder %s1444_s17, 0 }
  0x49   : > { %s1299_s20 = sand.u32 (!%p1449_p5), 1, %s1117_s10   ;;  %p1450_p0 = scmp.ne.s32.totalorder (!%p1449_p5), %s1442_s15, 0 }
  0x4a   : > { %143 = sbr.rel (%p1449_p5) target bundleno = 1367 (0x557), region = 28  ;;  %s811_s26 = sshll.u32 (!%p1449_p5), %s1299_s20, 3 }
  0x4b   : > { %s146_s19 = scalar_lea.sflag (!%p1449_p5), [#allocation3], %s1299_s20  ;;  %s149_s29 = scalar_lea.vmem (!%p1449_p5), [#allocation2], %s811_s26 }
  0x51   : > { %1100 = dma.done.wait (%p1450_p0), %s146_s19, 128  }
  0x52   : > { %1102 = vsyncadd (%p1450_p0), %s146_s19, 4294967168  ;;  %p1451_p11 = scmp.eq.s32.totalorder %s1184_s13, 0 }
  0x54   : > { %1104 = dma.done.wait (%p1451_p11), [#allocation6], 256   ;;  %p1452_p1 = pmov %p1451_p11 }
  0x55   : > { %v1131_v0 = vmov 0.0   ;;  %vm1132_vm0 = vmmov 0   ;;  %v979_v1 = vld [vmem:[#allocation5] sm:$0xff]   ;;  %v980_v2 = vld [vmem:[#allocation5 + $0x8] sm:$0xff]   ;;  %v175_v3 = vld [vmem:[%s149_s29] sm:$0xff]  ;;  %vm193_vm1 = vcmask 261120   ;;  %v238_v21 = vlaneseq }
  0x56   : > { %1106 = vsyncadd (%p1452_p1), [#allocation6], 4294967040  ;;  %848 = vmatprep.subr.bf16.mxu0 %v1131_v0  ;;  %852 = vmatprep.mubr.msk.bf16.mxu0 %vm1132_vm0, %v1131_v0  ;;  %v176_v4 = vpack.c.bf16 %v175_v3, %v175_v3  ;;  %s1133_s15 = smov 120   ;;  %s1134_s17 = smov 96   ;;  %vm246_vm2 = vcmask 64512   ;;  %vm312_vm4 = vcmask 1043456  }
  0x57   : > { %856 = vmatprep.subr.bf16.mxu1 %v1131_v0  ;;  %858 = vmatprep.mubr.msk.bf16.mxu1 %vm1132_vm0, %v1131_v0  ;;  %s1135_s27 = smov 80   ;;  %s1136_s22 = smov 88   ;;  %v239_v22 = vshrl.u32 %v238_v21, 7  ;;  %v241_v23 = vand.u32 127, %v238_v21  ;;  %vm705_vm5 = vcmask 130048   ;;  %vm707_vm6 = vcmask 195584  }
  0x58   : > { %849 = vmatpush3.bf16.msra.mxu0 %v979_v1  ;;  %s1137_s23 = smov 72   ;;  %s1138_s28 = smov 112  }
  0x59   : > { %850 = vmatprep.subr.bf16.mxu0 %v1131_v0  ;;  %s1139_s30 = smov 104   ;;  %vm242_vm3 = vcmp.le.s32.totalorder %v241_v23, %v239_v22  ;;  %s1140_s3 = smov 56  }
  0x5a   : > { %s1141_s4 = smov 64   ;;  %s1142_s5 = smov 40  }
  0x5b   : > { %s1143_s6 = smov 48   ;;  %s1144_s7 = smov 8  }
  0x5c   : > { %851 = vmatpush3.bf16.msra.mxu0 %v980_v2  ;;  %s1145_s18 = smov 16   ;;  %s1146_s24 = smov 24  }
  0x5d   : > { %862 = vmatprep.subr.bf16.mxu0 %v1131_v0  ;;  %s826_s25 = sshll.u32 %s1184_s13, 7  ;;  %s173_s19 = scalar_lea.vmem [#allocation7], %s811_s26 }
  0x5e   : > { %s724_s29 = sshll.u32 %s173_s19, 4  ;;  %s711_s13 = scalar_lea.sflag [#allocation4], %s1299_s20  ;;  %s1393_s29 = int_to_ptr.vmem [resolvable:$true] %s724_s29 }
  0x5f   : > { %853 = vmatmul.mubr.msk.bf16.vlgmr.msra.gmra.mrb[0].mxu0 %vm193_vm1, %v176_v4  ;;  %s1055_s26 = scalar_lea.vmem %s1393_s29, 128 }
  0x60   : > { %864 = vmatprep.mubr.msk.bf16.mxu0 %vm1132_vm0, %v1131_v0  ;;  %p1056_p4 = scmp.ne.s32.totalorder %s1393_s29, %s1055_s26 }
  0x62   : > { %p1057_p6 = pnand %p1056_p4, %p1254_p12 }
  0x64   : > { %p1058_p8 = pneg %p1057_p6 }
 0x132   : > { %v231_v5 = vpop.f32.mrb[0].mxu0 }
 0x133   : > { %v1324_v6 = vpack.c.bf16 %v231_v5, %v231_v5  ;;  %v854_v7 = vpop.f32.mrb[1].mxu0 }
 0x134   : > { %v234_v8 = vpop.f32.mrb[2].mxu0 }
 0x135   : > { %356 = vrot.lane.b32.xlu1 %v1324_v6, %s1133_s15  ;;  %244 = vrot.lane.b32.xlu0 %v1324_v6, %s1134_s17  ;;  %v855_v9 = vpop.f32.mrb[3].mxu0 }
 0x139   : > { %470 = vrot.lane.b32.xlu1 %v1324_v6, %s1135_s27  ;;  %358 = vrot.lane.b32.xlu0 %v1324_v6, %s1136_s22  ;;  %s1391_s27 = scalar_lea.hbm %s1438_s2, %s826_s25  ;;  %s1147_s22 = smov [#allocation7]  }
 0x13d   : > { %582 = vrot.lane.b32.xlu1 %v1324_v6, %s1137_s23  ;;  %468 = vrot.lane.b32.xlu0 %v1324_v6, %s1138_s28  ;;  %s1059_s23 = sshll.u32 %s1147_s22, 4  ;;  %s1060_s23 = int_to_ptr.vmem [resolvable:$false] %s1059_s23 }
 0x13e   : > { %s1061_s28 = scalar_lea.vmem %s1060_s23, 256  ;;  %p1062_p10 = scmp.lt.s32.totalorder %s1393_s29, %s1060_s23 }
 0x13f   : > { %p1063_p13 = scmp.lt.s32.totalorder %s1061_s28, %s1055_s26 }
 0x141   : > { %580 = vrot.lane.b32.xlu0 %v1324_v6, %s1139_s30  ;;  %p1064_p3 = por %p1063_p13, %p1062_p10 }
 0x143   : > { %p1065_p7 = pnand %p1064_p3, %p1058_p8 }
 0x1a7   : > { %v245_v10 = vpop.permute.xlu0 %244  ;;  %v357_v13 = vpop.permute.xlu1 %356 }
 0x1a8   : > { %v251_v11 = vsel %vm246_vm2, %v245_v10, 0 }
 0x1a9   : > { %857 = vmatpush3.bf16.xpose.msra.mxu1 %v251_v11 }
 0x1aa   : > { %868 = vmatprep.subr.bf16.mxu1 %v1131_v0 }
 0x1ab   : > { %v359_v12 = vpop.permute.xlu0 %358  ;;  %v471_v15 = vpop.permute.xlu1 %470 }
 0x1ac   : > { %v364_v14 = vsel %vm246_vm2, %v359_v12, 0  ;;  %v476_v16 = vsel %vm246_vm2, %v471_v15, 0 }
 0x1af   : > { %v583_v17 = vpop.permute.xlu1 %582  ;;  %v469_v18 = vpop.permute.xlu0 %468 }
 0x1b0   : > { %859 = vmatmul.mubr.msk.bf16.vlgmr.msra.gmra.mrb[0].mxu1 %vm246_vm2, %v1324_v6  ;;  %v588_v19 = vsel %vm246_vm2, %v583_v17, 0 }
 0x1b1   : > { %869 = vmatpush3.bf16.xpose.msra.mxu1 %v364_v14  ;;  %870 = vmatprep.mubr.msk.bf16.mxu1 %vm1132_vm0, %v1131_v0 }
 0x1b2   : > { %880 = vmatprep.subr.bf16.mxu1 %v1131_v0 }
 0x1b3   : > { %v581_v20 = vpop.permute.xlu0 %580 }
 0x1b8   : > { %871 = vmatmul.mubr.msk.bf16.vlgmr.msra.gmra.mrb[4].mxu1 %vm246_vm2, %v357_v13 }
 0x1b9   : > { %881 = vmatpush3.bf16.xpose.msra.mxu1 %v476_v16  ;;  %882 = vmatprep.mubr.msk.bf16.mxu1 %vm1132_vm0, %v1131_v0 }
 0x1ba   : > { %892 = vmatprep.subr.bf16.mxu1 %v1131_v0 }
 0x1c0   : > { %883 = vmatmul.mubr.msk.bf16.vlgmr.msra.gmra.mrb[8].mxu1 %vm246_vm2, %v469_v18 }
 0x1c1   : > { %893 = vmatpush3.bf16.xpose.msra.mxu1 %v588_v19  ;;  %894 = vmatprep.mubr.msk.bf16.mxu1 %vm1132_vm0, %v1131_v0 }
 0x1c8   : > { %895 = vmatmul.mubr.msk.bf16.vlgmr.msra.gmra.mrb[12].mxu1 %vm246_vm2, %v581_v20 }
 0x283   : > { %v287_v24 = vpop.f32.mrb[0].mxu1 }
 0x284   : > { %v293_v25 = vmul.f32 0.35355338, %v287_v24  ;;  %v860_v26 = vpop.f32.mrb[1].mxu1 }
 0x285   : > { %v290_v27 = vpop.f32.mrb[2].mxu1 }
 0x286   : > { %v861_v28 = vpop.f32.mrb[3].mxu1  ;;  %v294_v29 = vsel %vm242_vm3, %v293_v25, -inf }
 0x287   : > { %v295_v30 = vsel %vm246_vm2, %v294_v29, -inf }
 0x288   : > { %296 = vmax.xlane.f32.xlu1 %v295_v30 }
 0x28b   : > { %v400_v31 = vpop.f32.mrb[4].mxu1 }
 0x28c   : > { %v406_v32 = vmul.f32 0.35355338, %v400_v31  ;;  %v872_v33 = vpop.f32.mrb[5].mxu1 }
 0x28d   : > { %v403_v34 = vpop.f32.mrb[6].mxu1 }
 0x28e   : > { %v873_v35 = vpop.f32.mrb[7].mxu1  ;;  %v407_v36 = vsel %vm242_vm3, %v406_v32, -inf }
 0x28f   : > { %v408_v37 = vsel %vm246_vm2, %v407_v36, -inf }
 0x290   : > { %409 = vmax.xlane.f32.xlu0 %v408_v37 }
 0x293   : > { %v512_v38 = vpop.f32.mrb[8].mxu1 }
 0x294   : > { %v518_v39 = vmul.f32 0.35355338, %v512_v38  ;;  %v884_v40 = vpop.f32.mrb[9].mxu1 }
 0x295   : > { %v515_v41 = vpop.f32.mrb[10].mxu1 }
 0x296   : > { %v885_v42 = vpop.f32.mrb[11].mxu1  ;;  %v519_v43 = vsel %vm242_vm3, %v518_v39, -inf }
 0x297   : > { %v520_v44 = vsel %vm246_vm2, %v519_v43, -inf }
 0x298   : > { %521 = vmax.xlane.f32.xlu0 %v520_v44 }
 0x29b   : > { %v624_v45 = vpop.f32.mrb[12].mxu1 }
 0x29c   : > { %v630_v46 = vmul.f32 0.35355338, %v624_v45  ;;  %v896_v47 = vpop.f32.mrb[13].mxu1 }
 0x29d   : > { %v627_v48 = vpop.f32.mrb[14].mxu1 }
 0x29e   : > { %v897_v49 = vpop.f32.mrb[15].mxu1  ;;  %v631_v50 = vsel %vm242_vm3, %v630_v46, -inf }
 0x29f   : > { %v632_v51 = vsel %vm246_vm2, %v631_v50, -inf }
 0x2a0   : > { %633 = vmax.xlane.f32.xlu1 %v632_v51 }
 0x315   : > { %v297_v52 = vpop.xlane.xlu1 %296 }
 0x316   : > { %v298_v53 = vsub.f32 %v294_v29, %v297_v52 }
 0x318   : > { %v299_v54 = vmul.f32 1.442695, %v298_v53 }
 0x31a   : > { %981 = vpow2.f32 %v299_v54 }
 0x31d   : > { %v410_v55 = vpop.xlane.xlu0 %409 }
 0x31e   : > { %v411_v56 = vsub.f32 %v407_v36, %v410_v55 }
 0x320   : > { %v412_v57 = vmul.f32 1.442695, %v411_v56 }
 0x322   : > { %983 = vpow2.f32 %v412_v57 }
 0x324   : > { %v982_v58 = vpop.eup %981 }
 0x325   : > { %v522_v59 = vpop.xlane.xlu0 %521  ;;  %v301_v60 = vsel %vm246_vm2, %v982_v58, 0.0 }
 0x326   : > { %v523_v61 = vsub.f32 %v519_v43, %v522_v59  ;;  %302 = vadd.xlane.f32.xlu0 %v301_v60 }
 0x328   : > { %v524_v62 = vmul.f32 1.442695, %v523_v61 }
 0x32a   : > { %985 = vpow2.f32 %v524_v62 }
 0x32c   : > { %v984_v63 = vpop.eup %983 }
 0x32d   : > { %v414_v1 = vsel %vm246_vm2, %v984_v63, 0.0  ;;  %v634_v4 = vpop.xlane.xlu1 %633 }
 0x32e   : > { %415 = vadd.xlane.f32.xlu1 %v414_v1  ;;  %v635_v5 = vsub.f32 %v631_v50, %v634_v4 }
 0x330   : > { %v636_v7 = vmul.f32 1.442695, %v635_v5 }
 0x332   : > { %987 = vpow2.f32 %v636_v7 }
 0x334   : > { %v986_v2 = vpop.eup %985 }
 0x335   : > { %v526_v3 = vsel %vm246_vm2, %v986_v2, 0.0 }
 0x336   : > { %527 = vadd.xlane.f32.xlu0 %v526_v3 }
 0x33c   : > { %v988_v8 = vpop.eup %987 }
 0x33d   : > { %v638_v9 = vsel %vm246_vm2, %v988_v8, 0.0 }
 0x33f   : > { %420 = vrot.lane.b32.xlu1 %v1324_v6, %s1140_s3 }
 0x34c   : > { %307 = vrot.lane.b32.xlu0 %v1324_v6, %s1141_s4 }
 0x350   : > { %644 = vrot.lane.b32.xlu0 %v1324_v6, %s1142_s5 }
 0x363   : > { %639 = vadd.xlane.f32.xlu1 %v638_v9 }
 0x374   : > { %532 = vrot.lane.b32.xlu1 %v1324_v6, %s1143_s6 }
 0x3b3   : > { %v303_v10 = vpop.xlane.xlu0 %302 }
 0x3b4   : > { %989 = vrcp.f32 %v303_v10 }
 0x3bb   : > { %v416_v11 = vpop.xlane.xlu1 %415 }
 0x3bc   : > { %991 = vrcp.f32 %v416_v11 }
 0x3be   : > { %v990_v12 = vpop.eup %989 }
 0x3bf   : > { %v305_v14 = vmul.f32 %v990_v12, %v982_v58  ;;  %v421_v17 = vpop.permute.xlu1 %420 }
 0x3c0   : > { %v426_v20 = vsel %vm312_vm4, %v421_v17, 0 }
 0x3c1   : > { %v306_v18 = vpack.c.bf16 %v305_v14, %v305_v14 }
 0x3c3   : > { %v528_v13 = vpop.xlane.xlu0 %527 }
 0x3c4   : > { %993 = vrcp.f32 %v528_v13 }
 0x3c6   : > { %v992_v19 = vpop.eup %991 }
 0x3c7   : > { %v308_v15 = vpop.permute.xlu0 %307  ;;  %v418_v6 = vmul.f32 %v992_v19, %v984_v63 }
 0x3c8   : > { %v314_v16 = vsel %vm312_vm4, %v308_v15, 0 }
 0x3c9   : > { %863 = vmatpush3.bf16.msra.mxu0 %v314_v16  ;;  %v419_v21 = vpack.c.bf16 %v418_v6, %v418_v6 }
 0x3ca   : > { %874 = vmatprep.subr.bf16.mxu0 %v1131_v0 }
 0x3cb   : > { %v645_v27 = vpop.permute.xlu0 %644 }
 0x3cc   : > { %865 = vmatmul.mubr.msk.bf16.vlgmr.msra.gmra.mrb[4].mxu0 %vm246_vm2, %v306_v18  ;;  %v650_v29 = vsel %vm312_vm4, %v645_v27, 0 }
 0x3cd   : > { %875 = vmatpush3.bf16.msra.mxu0 %v426_v20  ;;  %876 = vmatprep.mubr.msk.bf16.mxu0 %vm1132_vm0, %v1131_v0 }
 0x3ce   : > { %886 = vmatprep.subr.bf16.mxu0 %v1131_v0  ;;  %v994_v22 = vpop.eup %993 }
 0x3cf   : > { %v530_v24 = vmul.f32 %v994_v22, %v986_v2 }
 0x3d1   : > { %v531_v28 = vpack.c.bf16 %v530_v24, %v530_v24 }
 0x3d4   : > { %877 = vmatmul.mubr.msk.bf16.vlgmr.msra.gmra.mrb[8].mxu0 %vm246_vm2, %v419_v21 }
 0x3d5   : > { %888 = vmatprep.mubr.msk.bf16.mxu0 %vm1132_vm0, %v1131_v0 }
 0x3f0   : > { %v640_v23 = vpop.xlane.xlu1 %639 }
 0x3f1   : > { %995 = vrcp.f32 %v640_v23 }
 0x3f4   : > { %v533_v25 = vpop.permute.xlu1 %532 }
 0x3f5   : > { %v538_v26 = vsel %vm312_vm4, %v533_v25, 0 }
 0x3f6   : > { %887 = vmatpush3.bf16.msra.mxu0 %v538_v26 }
 0x3f7   : > { %898 = vmatprep.subr.bf16.mxu0 %v1131_v0 }
 0x3f9   : > { %889 = vmatmul.mubr.msk.bf16.vlgmr.msra.gmra.mrb[12].mxu0 %vm246_vm2, %v531_v28 }
 0x3fa   : > { %899 = vmatpush3.bf16.msra.mxu0 %v650_v29  ;;  %900 = vmatprep.mubr.msk.bf16.mxu0 %vm1132_vm0, %v1131_v0 }
 0x3fb   : > { %v996_v30 = vpop.eup %995 }
 0x3fc   : > { %v642_v31 = vmul.f32 %v996_v30, %v988_v8 }
 0x3fe   : > { %v643_v32 = vpack.c.bf16 %v642_v31, %v642_v31 }
 0x401   : > { %901 = vmatmul.mubr.msk.bf16.vlgmr.msra.gmra.mrb[16].mxu0 %vm246_vm2, %v643_v32 }
 0x49f   : > { %v350_v33 = vpop.f32.mrb[4].mxu0 }
 0x4a0   : > { %v866_v34 = vpop.f32.mrb[5].mxu0 }
 0x4a1   : > { %v353_v35 = vpop.f32.mrb[6].mxu0 }
 0x4a2   : > { %v867_v36 = vpop.f32.mrb[7].mxu0 }
 0x4a7   : > { %v462_v37 = vpop.f32.mrb[8].mxu0 }
 0x4a8   : > { %693 = vrot.lane.b32.xlu1 %v462_v37, %s1144_s7  ;;  %v878_v38 = vpop.f32.mrb[9].mxu0 }
 0x4a9   : > { %v465_v39 = vpop.f32.mrb[10].mxu0 }
 0x4aa   : > { %v879_v40 = vpop.f32.mrb[11].mxu0 }
 0x4cc   : > { %v574_v41 = vpop.f32.mrb[12].mxu0 }
 0x4cd   : > { %697 = vrot.lane.b32.xlu0 %v574_v41, %s1145_s18  ;;  %v890_v0 = vpop.f32.mrb[13].mxu0 }
 0x4ce   : > { %v577_v42 = vpop.f32.mrb[14].mxu0 }
 0x4cf   : > { %v891_v43 = vpop.f32.mrb[15].mxu0 }
 0x4d4   : > { %v686_v44 = vpop.f32.mrb[16].mxu0 }
 0x4d5   : > { %701 = vrot.lane.b32.xlu1 %v686_v44, %s1146_s24  ;;  %v902_v45 = vpop.f32.mrb[17].mxu0 }
 0x4d6   : > { %v689_v46 = vpop.f32.mrb[18].mxu0 }
 0x4d7   : > { %v903_v47 = vpop.f32.mrb[19].mxu0 }
 0x51a   : > { %v694_v48 = vpop.permute.xlu1 %693 }
 0x51b   : > { %v704_v50 = vsel %vm246_vm2, %v350_v33, %v694_v48 }
 0x53f   : > { %v698_v49 = vpop.permute.xlu0 %697 }
 0x540   : > { %v706_v51 = vsel %vm705_vm5, %v704_v50, %v698_v49 }
 0x547   : > { %v702_v52 = vpop.permute.xlu1 %701 }
 0x548   : > { %v708_v53 = vsel %vm707_vm6, %v706_v51, %v702_v52 }
 0x549   : > { %709 = vst.msk [vmem:[%s173_s19] sm:$0xff] %vm193_vm1, %v708_v53 }
 0x54a   : > { %1068 = shalt.err (!%p1065_p7)
}
 0x54b   : > { %s1069_s20 = scalar_lea.hbm %s1391_s27, 128  ;;  %s1073_s4 = scalar_lea.hbm %s1438_s2, 256 }
 0x54c   : > { %p1070_p9 = scmp.ne.s32.totalorder %s1391_s27, %s1069_s20  ;;  %p1074_p0 = scmp.lt.u32.totalorder %s1391_s27, %s1438_s2 }
 0x54d   : > { %p1075_p11 = scmp.lt.u32.totalorder %s1073_s4, %s1069_s20  ;;  %p1077_p4 = scmp.lt.u32.totalorder %s1069_s20, %s1391_s27 }
 0x54e   : > { %p1071_p2 = pnand %p1070_p9, %p1254_p12 }
 0x54f   : > { %p1076_p1 = por %p1075_p11, %p1074_p0 }
 0x550   : > { %p1072_p5 = pneg %p1071_p2 }
 0x551   : > { %p1078_p6 = por %p1077_p4, %p1076_p1 }
 0x553   : > { %p1079_p8 = pnand %p1078_p6, %p1072_p5 }
 0x555   : > { %1082 = shalt.err (!%p1079_p8)
}
 0x556   : > { %910 = dma.vmem_to_hbm [thread:$0]  (%p1254_p12), %s1393_s29, 128, %s1391_s27, %s711_s13  }
 0x557 PF: > { %s736_s7 = sand.u32 1, %s1113_s9   ;;  %p1453_p10 = scmp.ne.s32.totalorder %s1443_s16, 0 }
 0x558   : > { %p1454_p13 = scmp.ge.s32.totalorder %s1125_s12, 2  ;;  %s737_s18 = scalar_lea.sflag [#allocation4], %s736_s7 }
 0x55a   : > { %p921_p3 = pnand %p1454_p13, %p1453_p10 }
 0x55c   : > { %1108 = dma.done.wait (!%p921_p3), %s737_s18, 128  }
 0x55d   : > { %1110 = vsyncadd (!%p921_p3), %s737_s18, 4294967168  ;;  %p16_p7 = scmp.ge.s32.totalorder %s1219_s21, 4   ;;  %s1455_s9 = smov %s1117_s10 }
 0x55e   : > { %s1456_s10 = smov %s1121_s11  ;;  %s1457_s11 = smov %s1250_s8 }
 0x55f   : > { %s1458_s12 = smov %s1219_s21  ;;  %18 = sbr.rel (!%p16_p7) target bundleno = 6 (0x6), region = 77 }
 0x566   :  { %742 = vsyncpa [#allocation3], 1 }
 0x567   :  { %744 = vsyncpa [#allocation3 + $0x1], 1 }
 0x568   :  { %745 = vsyncpa [#allocation6], 1 }
 0x569   :  { %746 = vsyncpa [#allocation4], 1 }
 0x56a   :  { %748 = vsyncpa [#allocation4 + $0x1], 1 }

</bundles_post_ra>
